<compile_context>
chip_gen: v5e
topology: v5e:2x2
jax: 0.10.0
libtpu: 0.0.40
codegen_flags: <defaults>
</compile_context>

<pallas_src>
import functools

import jax
import jax.numpy as jnp
import numpy as np
from jax.experimental import pallas as pl
from jax.experimental.pallas import tpu as pltpu


def _box1d(x, axis, r):
    """Zero-padded (2r+1)-tap box sum along `axis` using XLU rolls.

    Boundary masks come from the rolled source-index iota, so the result is
    independent of the roll direction convention (wrapped positions are exactly
    those whose |src - dst| distance is n - s > r).
    """
    if r == 0:
        return x
    n = x.shape[axis]
    idx = jax.lax.broadcasted_iota(jnp.int32, x.shape, axis)
    acc = x
    for s in range(1, r + 1):
        for shift in (s, n - s):                     # both rotation directions
            rolled = pltpu.roll(x, shift=shift, axis=axis)
            src = pltpu.roll(idx, shift=shift, axis=axis)
            acc = acc + jnp.where(jnp.abs(src - idx) == s, rolled, 0.0)
    return acc


def _boundary_loss_kernel(pred_ref, target_ref, out_ref, *, ksize, ignore_index):
    """Per-batch fused BoundaryLoss partial sum.

    pred_ref:   (1, C, H, W)  logits block for one batch element (any float dtype)
    target_ref: (1, H, W)     int32 class labels
    out_ref:    (1, 1, 1)     f32 partial sum of squared edge errors for this batch
    """
    r = ksize // 2
    a = 1.0 / (ksize * ksize - 1)
    C, H, W = pred_ref.shape[1], pred_ref.shape[2], pred_ref.shape[3]

    pred = pred_ref[0].astype(jnp.float32)                     # (C, H, W)
    tgt = target_ref[0]                                        # (H, W) int32

    # ---- softmax over channels (leading axis -> cheap cross-vreg reduce) -------
    m = jnp.max(pred, axis=0, keepdims=True)
    e = jnp.exp(pred - m)
    sm = e * pl.reciprocal(jnp.sum(e, axis=0, keepdims=True), approx=True)

    # ---- one-hot(target) over channels ------------------------------------------
    cls = jax.lax.broadcasted_iota(jnp.int32, (C, H, W), 0)
    onehot = (cls == tgt[None, :, :]).astype(jnp.float32)      # (C, H, W)

    valid = [c for c in range(C) if c != ignore_index]         # static exclusion

    def edge_max(x):
        # edge(x) = a * box_kxk(x) - (a+1) * x   (separable box via XLU rolls)
        box = _box1d(_box1d(x, axis=2, r=r), axis=1, r=r)      # lanes then sublanes
        edges = a * box - (a + 1.0) * x                        # (C, H, W)
        return functools.reduce(jnp.maximum, [edges[c] for c in valid])  # (H, W)

    d = edge_max(sm) - edge_max(onehot)                        # (H, W)
    out_ref[...] = jnp.sum(d * d, keepdims=True)[None]         # (1, 1, 1) partial


def boundary_loss(pred, target, kernel_size=3, ignore_index=0):
    """pred: (B, C, H, W) float logits (bf16/f32), target: (B, H, W) int labels."""
    B, C, H, W = pred.shape
    k = kernel_size
    if H < k or W < k:
        raise ValueError("spatial dims must be >= kernel_size")
    if not [c for c in range(C) if c != ignore_index]:
        raise ValueError("no valid (non-ignored) classes")

    kernel = functools.partial(
        _boundary_loss_kernel, ksize=k, ignore_index=ignore_index)

    partials = pl.pallas_call(
        kernel,
        out_shape=jax.ShapeDtypeStruct((B, 1, 1), jnp.float32),
        grid_spec=pltpu.PrefetchScalarGridSpec(
            num_scalar_prefetch=0,
            grid=(B,),
            in_specs=[
                # blocks cover the full trailing dims -> (8,128) rule satisfied.
                pl.BlockSpec((1, C, H, W), lambda b: (b, 0, 0, 0)),
                pl.BlockSpec((1, H, W), lambda b: (b, 0, 0)),
            ],
            out_specs=pl.BlockSpec((1, 1, 1), lambda b: (b, 0, 0)),
        ),
        compiler_params=pltpu.CompilerParams(
            # per-batch partial outputs -> safe to shard across both v7x TCs
            dimension_semantics=("parallel",),
        ),
    )(pred, target.astype(jnp.int32))

    return jnp.sum(partials) * (1.0 / float(B * H * W))


# ----------------------------------------------------------------------------
# Pure-JAX reference (mirrors the PyTorch module)
# ----------------------------------------------------------------------------
def boundary_loss_reference(pred, target, kernel_size=3, ignore_index=0):
    B, C, H, W = pred.shape
    k = kernel_size
    w = np.full((k, k), 1.0 / (k * k - 1), np.float32)
    w[k // 2, k // 2] = -1.0
    w = jnp.asarray(w).reshape(k, k, 1, 1)                     # HWIO, 1->1 channel

    def edge_all_channels(x_bchw):
        x = x_bchw.reshape(B * C, H, W, 1)
        y = jax.lax.conv_general_dilated(
            x, w, window_strides=(1, 1),
            padding=[(k // 2, k // 2), (k // 2, k // 2)],
            dimension_numbers=("NHWC", "HWIO", "NHWC"))
        return y.reshape(B, C, H, W)

    onehot = jax.nn.one_hot(target, C, dtype=jnp.float32)      # (B, H, W, C)
    onehot = jnp.transpose(onehot, (0, 3, 1, 2))                # (B, C, H, W)
    sm = jax.nn.softmax(pred.astype(jnp.float32), axis=1)

    valid = [c for c in range(C) if c != ignore_index]
    t_edges = edge_all_channels(onehot)[:, valid].max(axis=1)   # (B, H, W)
    p_edges = edge_all_channels(sm)[:, valid].max(axis=1)       # (B, H, W)
    return jnp.mean((p_edges - t_edges) ** 2)


# ----------------------------------------------------------------------------
if __name__ == "__main__":
    key = jax.random.PRNGKey(0)
    k_pred, k_tgt = jax.random.split(key)

    B, C, H, W = 2, 4, 16, 16                                   # small test shapes
    # Logits kept in their native mixed-precision dtype (halves the HBM read);
    # the reference sees the exact same (bf16-quantised) values upcast to f32.
    pred = jax.random.normal(k_pred, (B, C, H, W), jnp.float32).astype(jnp.bfloat16)
    target = jax.random.randint(k_tgt, (B, H, W), 0, C, dtype=jnp.int32)

    loss = jax.block_until_ready(boundary_loss(pred, target, kernel_size=3, ignore_index=0))
    ref = jax.block_until_ready(boundary_loss_reference(pred, target, 3, 0))

    # Tolerance loosened slightly for pl.reciprocal(approx=True) in the kernel softmax.
    np.testing.assert_allclose(np.asarray(loss), np.asarray(ref), rtol=5e-3, atol=1e-5)
    print("KERNEL_OK")
</pallas_src>

<mosaic_0001>
module attributes {stable_mosaic.version = 11 : i64} {
  func.func @_boundary_loss_kernel(%arg0: i32, %arg1: memref<1x4x16x16xbf16, #tpu.memory_space<vmem>>, %arg2: memref<1x16x16xi32, #tpu.memory_space<vmem>>, %arg3: memref<1x1x1xf32, #tpu.memory_space<vmem>>) attributes {dimension_semantics = [#tpu.dimension_semantics<parallel>], iteration_bounds = array<i64: 2>, scalar_prefetch = 0 : i64, scratch_operands = 0 : i64, tpu.core_type = #tpu.core_type<tc>, window_params = [{transform_indices = @transform_0, window_bounds = array<i64: 1, 4, 16, 16>}, {transform_indices = @transform_1, window_bounds = array<i64: 1, 16, 16>}, {transform_indices = @transform_2, window_bounds = array<i64: 1, 1, 1>}]} {
    %c0 = arith.constant 0 : index
    %c0_0 = arith.constant 0 : index
    %c0_1 = arith.constant 0 : index
    %c0_2 = arith.constant 0 : index
    %0 = vector.load %arg1[%c0, %c0_0, %c0_1, %c0_2] : memref<1x4x16x16xbf16, #tpu.memory_space<vmem>>, vector<1x4x16x16xbf16>
    %1 = vector.shape_cast %0 : vector<1x4x16x16xbf16> to vector<4x16x16xbf16>
    %2 = arith.extf %1 : vector<4x16x16xbf16> to vector<4x16x16xf32>
    %c0_3 = arith.constant 0 : index
    %c0_4 = arith.constant 0 : index
    %c0_5 = arith.constant 0 : index
    %3 = vector.load %arg2[%c0_3, %c0_4, %c0_5] : memref<1x16x16xi32, #tpu.memory_space<vmem>>, vector<1x16x16xi32>
    %4 = vector.shape_cast %3 : vector<1x16x16xi32> to vector<16x16xi32>
    %cst = arith.constant dense<0xFF800000> : vector<16x16xf32>
    %5 = vector.multi_reduction <maximumf>, %2, %cst [0] : vector<4x16x16xf32> to vector<16x16xf32>
    %6 = vector.shape_cast %5 : vector<16x16xf32> to vector<1x16x16xf32>
    %7 = vector.broadcast %6 : vector<1x16x16xf32> to vector<4x16x16xf32>
    %8 = arith.subf %2, %7 : vector<4x16x16xf32>
    %9 = math.exp %8 : vector<4x16x16xf32>
    %cst_6 = arith.constant dense<0.000000e+00> : vector<16x16xf32>
    %10 = vector.multi_reduction <add>, %9, %cst_6 [0] : vector<4x16x16xf32> to vector<16x16xf32>
    %11 = vector.shape_cast %10 : vector<16x16xf32> to vector<1x16x16xf32>
    %12 = tpu.reciprocal %11 {approx = true} : vector<1x16x16xf32> -> vector<1x16x16xf32>
    %13 = vector.broadcast %12 : vector<1x16x16xf32> to vector<4x16x16xf32>
    %14 = arith.mulf %9, %13 : vector<4x16x16xf32>
    %15 = tpu.iota {dimensions = array<i32: 0>} : vector<4x16x16xi32>
    %16 = vector.shape_cast %4 : vector<16x16xi32> to vector<1x16x16xi32>
    %17 = vector.broadcast %16 : vector<1x16x16xi32> to vector<4x16x16xi32>
    %18 = arith.cmpi eq, %15, %17 : vector<4x16x16xi32>
    %19 = arith.extui %18 : vector<4x16x16xi1> to vector<4x16x16xi32>
    %20 = arith.sitofp %19 : vector<4x16x16xi32> to vector<4x16x16xf32>
    %21 = tpu.iota {dimensions = array<i32: 2>} : vector<4x16x16xi32>
    %c1_i32 = arith.constant 1 : i32
    %22 = tpu.dynamic_rotate %14 by %c1_i32 dim 2 : vector<4x16x16xf32>, i32 -> vector<4x16x16xf32>
    %c1_i32_7 = arith.constant 1 : i32
    %23 = tpu.dynamic_rotate %21 by %c1_i32_7 dim 2 : vector<4x16x16xi32>, i32 -> vector<4x16x16xi32>
    %24 = arith.subi %23, %21 : vector<4x16x16xi32>
    %25 = math.absi %24 : vector<4x16x16xi32>
    %c1_i32_8 = arith.constant 1 : i32
    %26 = vector.broadcast %c1_i32_8 : i32 to vector<4x16x16xi32>
    %27 = arith.cmpi eq, %25, %26 : vector<4x16x16xi32>
    %cst_9 = arith.constant 0.000000e+00 : f32
    %28 = vector.broadcast %cst_9 : f32 to vector<4x16x16xf32>
    %29 = arith.select %27, %22, %28 : vector<4x16x16xi1>, vector<4x16x16xf32>
    %30 = arith.addf %14, %29 : vector<4x16x16xf32>
    %c15_i32 = arith.constant 15 : i32
    %31 = tpu.dynamic_rotate %14 by %c15_i32 dim 2 : vector<4x16x16xf32>, i32 -> vector<4x16x16xf32>
    %c15_i32_10 = arith.constant 15 : i32
    %32 = tpu.dynamic_rotate %21 by %c15_i32_10 dim 2 : vector<4x16x16xi32>, i32 -> vector<4x16x16xi32>
    %33 = arith.subi %32, %21 : vector<4x16x16xi32>
    %34 = math.absi %33 : vector<4x16x16xi32>
    %c1_i32_11 = arith.constant 1 : i32
    %35 = vector.broadcast %c1_i32_11 : i32 to vector<4x16x16xi32>
    %36 = arith.cmpi eq, %34, %35 : vector<4x16x16xi32>
    %cst_12 = arith.constant 0.000000e+00 : f32
    %37 = vector.broadcast %cst_12 : f32 to vector<4x16x16xf32>
    %38 = arith.select %36, %31, %37 : vector<4x16x16xi1>, vector<4x16x16xf32>
    %39 = arith.addf %30, %38 : vector<4x16x16xf32>
    %40 = tpu.iota {dimensions = array<i32: 1>} : vector<4x16x16xi32>
    %c1_i32_13 = arith.constant 1 : i32
    %41 = tpu.dynamic_rotate %39 by %c1_i32_13 dim 1 : vector<4x16x16xf32>, i32 -> vector<4x16x16xf32>
    %c1_i32_14 = arith.constant 1 : i32
    %42 = tpu.dynamic_rotate %40 by %c1_i32_14 dim 1 : vector<4x16x16xi32>, i32 -> vector<4x16x16xi32>
    %43 = arith.subi %42, %40 : vector<4x16x16xi32>
    %44 = math.absi %43 : vector<4x16x16xi32>
    %c1_i32_15 = arith.constant 1 : i32
    %45 = vector.broadcast %c1_i32_15 : i32 to vector<4x16x16xi32>
    %46 = arith.cmpi eq, %44, %45 : vector<4x16x16xi32>
    %cst_16 = arith.constant 0.000000e+00 : f32
    %47 = vector.broadcast %cst_16 : f32 to vector<4x16x16xf32>
    %48 = arith.select %46, %41, %47 : vector<4x16x16xi1>, vector<4x16x16xf32>
    %49 = arith.addf %39, %48 : vector<4x16x16xf32>
    %c15_i32_17 = arith.constant 15 : i32
    %50 = tpu.dynamic_rotate %39 by %c15_i32_17 dim 1 : vector<4x16x16xf32>, i32 -> vector<4x16x16xf32>
    %c15_i32_18 = arith.constant 15 : i32
    %51 = tpu.dynamic_rotate %40 by %c15_i32_18 dim 1 : vector<4x16x16xi32>, i32 -> vector<4x16x16xi32>
    %52 = arith.subi %51, %40 : vector<4x16x16xi32>
    %53 = math.absi %52 : vector<4x16x16xi32>
    %c1_i32_19 = arith.constant 1 : i32
    %54 = vector.broadcast %c1_i32_19 : i32 to vector<4x16x16xi32>
    %55 = arith.cmpi eq, %53, %54 : vector<4x16x16xi32>
    %cst_20 = arith.constant 0.000000e+00 : f32
    %56 = vector.broadcast %cst_20 : f32 to vector<4x16x16xf32>
    %57 = arith.select %55, %50, %56 : vector<4x16x16xi1>, vector<4x16x16xf32>
    %58 = arith.addf %49, %57 : vector<4x16x16xf32>
    %cst_21 = arith.constant 1.250000e-01 : f32
    %59 = vector.broadcast %cst_21 : f32 to vector<4x16x16xf32>
    %60 = arith.mulf %59, %58 : vector<4x16x16xf32>
    %cst_22 = arith.constant 1.125000e+00 : f32
    %61 = vector.broadcast %cst_22 : f32 to vector<4x16x16xf32>
    %62 = arith.mulf %61, %14 : vector<4x16x16xf32>
    %63 = arith.subf %60, %62 : vector<4x16x16xf32>
    %64 = vector.extract_strided_slice %63 {offsets = [1, 0, 0], sizes = [1, 16, 16], strides = [1, 1, 1]} : vector<4x16x16xf32> to vector<1x16x16xf32>
    %65 = vector.shape_cast %64 : vector<1x16x16xf32> to vector<16x16xf32>
    %66 = vector.extract_strided_slice %63 {offsets = [2, 0, 0], sizes = [1, 16, 16], strides = [1, 1, 1]} : vector<4x16x16xf32> to vector<1x16x16xf32>
    %67 = vector.shape_cast %66 : vector<1x16x16xf32> to vector<16x16xf32>
    %68 = vector.extract_strided_slice %63 {offsets = [3, 0, 0], sizes = [1, 16, 16], strides = [1, 1, 1]} : vector<4x16x16xf32> to vector<1x16x16xf32>
    %69 = vector.shape_cast %68 : vector<1x16x16xf32> to vector<16x16xf32>
    %70 = arith.maximumf %65, %67 : vector<16x16xf32>
    %71 = arith.maximumf %70, %69 : vector<16x16xf32>
    %72 = tpu.iota {dimensions = array<i32: 2>} : vector<4x16x16xi32>
    %c1_i32_23 = arith.constant 1 : i32
    %73 = tpu.dynamic_rotate %20 by %c1_i32_23 dim 2 : vector<4x16x16xf32>, i32 -> vector<4x16x16xf32>
    %c1_i32_24 = arith.constant 1 : i32
    %74 = tpu.dynamic_rotate %72 by %c1_i32_24 dim 2 : vector<4x16x16xi32>, i32 -> vector<4x16x16xi32>
    %75 = arith.subi %74, %72 : vector<4x16x16xi32>
    %76 = math.absi %75 : vector<4x16x16xi32>
    %c1_i32_25 = arith.constant 1 : i32
    %77 = vector.broadcast %c1_i32_25 : i32 to vector<4x16x16xi32>
    %78 = arith.cmpi eq, %76, %77 : vector<4x16x16xi32>
    %cst_26 = arith.constant 0.000000e+00 : f32
    %79 = vector.broadcast %cst_26 : f32 to vector<4x16x16xf32>
    %80 = arith.select %78, %73, %79 : vector<4x16x16xi1>, vector<4x16x16xf32>
    %81 = arith.addf %20, %80 : vector<4x16x16xf32>
    %c15_i32_27 = arith.constant 15 : i32
    %82 = tpu.dynamic_rotate %20 by %c15_i32_27 dim 2 : vector<4x16x16xf32>, i32 -> vector<4x16x16xf32>
    %c15_i32_28 = arith.constant 15 : i32
    %83 = tpu.dynamic_rotate %72 by %c15_i32_28 dim 2 : vector<4x16x16xi32>, i32 -> vector<4x16x16xi32>
    %84 = arith.subi %83, %72 : vector<4x16x16xi32>
    %85 = math.absi %84 : vector<4x16x16xi32>
    %c1_i32_29 = arith.constant 1 : i32
    %86 = vector.broadcast %c1_i32_29 : i32 to vector<4x16x16xi32>
    %87 = arith.cmpi eq, %85, %86 : vector<4x16x16xi32>
    %cst_30 = arith.constant 0.000000e+00 : f32
    %88 = vector.broadcast %cst_30 : f32 to vector<4x16x16xf32>
    %89 = arith.select %87, %82, %88 : vector<4x16x16xi1>, vector<4x16x16xf32>
    %90 = arith.addf %81, %89 : vector<4x16x16xf32>
    %91 = tpu.iota {dimensions = array<i32: 1>} : vector<4x16x16xi32>
    %c1_i32_31 = arith.constant 1 : i32
    %92 = tpu.dynamic_rotate %90 by %c1_i32_31 dim 1 : vector<4x16x16xf32>, i32 -> vector<4x16x16xf32>
    %c1_i32_32 = arith.constant 1 : i32
    %93 = tpu.dynamic_rotate %91 by %c1_i32_32 dim 1 : vector<4x16x16xi32>, i32 -> vector<4x16x16xi32>
    %94 = arith.subi %93, %91 : vector<4x16x16xi32>
    %95 = math.absi %94 : vector<4x16x16xi32>
    %c1_i32_33 = arith.constant 1 : i32
    %96 = vector.broadcast %c1_i32_33 : i32 to vector<4x16x16xi32>
    %97 = arith.cmpi eq, %95, %96 : vector<4x16x16xi32>
    %cst_34 = arith.constant 0.000000e+00 : f32
    %98 = vector.broadcast %cst_34 : f32 to vector<4x16x16xf32>
    %99 = arith.select %97, %92, %98 : vector<4x16x16xi1>, vector<4x16x16xf32>
    %100 = arith.addf %90, %99 : vector<4x16x16xf32>
    %c15_i32_35 = arith.constant 15 : i32
    %101 = tpu.dynamic_rotate %90 by %c15_i32_35 dim 1 : vector<4x16x16xf32>, i32 -> vector<4x16x16xf32>
    %c15_i32_36 = arith.constant 15 : i32
    %102 = tpu.dynamic_rotate %91 by %c15_i32_36 dim 1 : vector<4x16x16xi32>, i32 -> vector<4x16x16xi32>
    %103 = arith.subi %102, %91 : vector<4x16x16xi32>
    %104 = math.absi %103 : vector<4x16x16xi32>
    %c1_i32_37 = arith.constant 1 : i32
    %105 = vector.broadcast %c1_i32_37 : i32 to vector<4x16x16xi32>
    %106 = arith.cmpi eq, %104, %105 : vector<4x16x16xi32>
    %cst_38 = arith.constant 0.000000e+00 : f32
    %107 = vector.broadcast %cst_38 : f32 to vector<4x16x16xf32>
    %108 = arith.select %106, %101, %107 : vector<4x16x16xi1>, vector<4x16x16xf32>
    %109 = arith.addf %100, %108 : vector<4x16x16xf32>
    %cst_39 = arith.constant 1.250000e-01 : f32
    %110 = vector.broadcast %cst_39 : f32 to vector<4x16x16xf32>
    %111 = arith.mulf %110, %109 : vector<4x16x16xf32>
    %cst_40 = arith.constant 1.125000e+00 : f32
    %112 = vector.broadcast %cst_40 : f32 to vector<4x16x16xf32>
    %113 = arith.mulf %112, %20 : vector<4x16x16xf32>
    %114 = arith.subf %111, %113 : vector<4x16x16xf32>
    %115 = vector.extract_strided_slice %114 {offsets = [1, 0, 0], sizes = [1, 16, 16], strides = [1, 1, 1]} : vector<4x16x16xf32> to vector<1x16x16xf32>
    %116 = vector.shape_cast %115 : vector<1x16x16xf32> to vector<16x16xf32>
    %117 = vector.extract_strided_slice %114 {offsets = [2, 0, 0], sizes = [1, 16, 16], strides = [1, 1, 1]} : vector<4x16x16xf32> to vector<1x16x16xf32>
    %118 = vector.shape_cast %117 : vector<1x16x16xf32> to vector<16x16xf32>
    %119 = vector.extract_strided_slice %114 {offsets = [3, 0, 0], sizes = [1, 16, 16], strides = [1, 1, 1]} : vector<4x16x16xf32> to vector<1x16x16xf32>
    %120 = vector.shape_cast %119 : vector<1x16x16xf32> to vector<16x16xf32>
    %121 = arith.maximumf %116, %118 : vector<16x16xf32>
    %122 = arith.maximumf %121, %120 : vector<16x16xf32>
    %123 = arith.subf %71, %122 : vector<16x16xf32>
    %124 = arith.mulf %123, %123 : vector<16x16xf32>
    %125 = vector.shape_cast %124 : vector<16x16xf32> to vector<1x16x16xf32>
    %cst_41 = arith.constant dense<0.000000e+00> : vector<1xf32>
    %126 = vector.multi_reduction <add>, %125, %cst_41 [1, 2] : vector<1x16x16xf32> to vector<1xf32>
    %127 = vector.shape_cast %126 : vector<1xf32> to vector<1x1x1xf32>
    %128 = vector.extract %127[0, 0, 0] : f32 from vector<1x1x1xf32>
    %129 = vector.broadcast %128 : f32 to vector<1x1xf32>
    %130 = vector.shape_cast %129 : vector<1x1xf32> to vector<1x1x1xf32>
    %c0_42 = arith.constant 0 : index
    %c0_43 = arith.constant 0 : index
    %c0_44 = arith.constant 0 : index
    %131 = vector.load %arg3[%c0_42, %c0_43, %c0_44] : memref<1x1x1xf32, #tpu.memory_space<vmem>>, vector<1x1x1xf32>
    tpu.vector_store %arg3[%c0_42, %c0_43, %c0_44], %130 {strides = array<i32>} : memref<1x1x1xf32, #tpu.memory_space<vmem>>, vector<1x1x1xf32>,
    return
  }
  func.func @transform_0(%arg0: i32) -> (i32, i32, i32, i32) {
    %c0_i32 = arith.constant 0 : i32
    %c0_i32_0 = arith.constant 0 : i32
    %c0_i32_1 = arith.constant 0 : i32
    %c0_i32_2 = arith.constant 0 : i32
    return %arg0, %c0_i32, %c0_i32_0, %c0_i32_1 : i32, i32, i32, i32
  }
  func.func @transform_1(%arg0: i32) -> (i32, i32, i32) {
    %c0_i32 = arith.constant 0 : i32
    %c0_i32_0 = arith.constant 0 : i32
    %c0_i32_1 = arith.constant 0 : i32
    return %arg0, %c0_i32, %c0_i32_0 : i32, i32, i32
  }
  func.func @transform_2(%arg0: i32) -> (i32, i32, i32) {
    %c0_i32 = arith.constant 0 : i32
    %c0_i32_0 = arith.constant 0 : i32
    %c0_i32_1 = arith.constant 0 : i32
    return %arg0, %c0_i32, %c0_i32_0 : i32, i32, i32
  }
}

</mosaic_0001>

<bundles_post_ra>
// kernel: tpu_custom_call.1
= control target key start
LH: loop header
LB: loop body
LE: loop exit
PB: predicated region body
PF: predicated region fallthrough
CT: control target
= control target key end

     0   :  { %7 = vsyncpa [#allocation3], 0  ;;  %s1676_s0 = inlined_call_operand.hbm [shape: bf16[2,4,16,16], index: 0, kind: input, shape index: {}]   ;;  %s1677_s1 = inlined_call_operand.hbm [shape: s32[2,16,16], index: 1, kind: input, shape index: {}]   ;;  %s1678_s2 = inlined_call_operand.vmem [shape: f32[2,1,1], index: 2, kind: output, shape index: {}]  }
   0x1   :  { %9 = vsyncpa [#allocation3 + $0x1], 0 }
   0x2   :  { %10 = vsyncpa [#allocation5], 0 }
   0x3   :  { %12 = vsyncpa [#allocation5 + $0x1], 0  ;;  %s1116_s9 = smov 0   ;;  %s1118_s10 = smov 0  }
   0x4   :  { %s1120_s11 = smov 0   ;;  %s1122_s12 = smov 0  }
   0x5 LB: > { %s1135_s13 = sadd.s32 4294967295, %s1089_s12   ;;  %s1138_s14 = sadd.s32 1, %s1089_s12   ;;  %s1089_s12 = sphi %s1122_s12, %s1686_s12   ;;  %s1085_s11 = sphi %s1120_s11, %s1685_s11   ;;  %s1081_s10 = sphi %s1118_s10, %s1684_s10   ;;  %s1077_s9 = sphi %s1116_s9, %s1683_s9  }
   0x6   : > { %s22_s15 = ssub.s32 %s1089_s12, %s1138_s14  ;;  %s25_s16 = sadd.s32 1, %s1085_s11 }
   0x7   : > { %p23_p0 = scmp.eq.s32.totalorder %s22_s15, 0  ;;  %p32_p1 = scmp.ne.s32.totalorder %s1085_s11, %s1081_s10 }
   0x8   : > { %p33_p2 = scmp.eq.s32.totalorder %s1089_s12, 0  ;;  %p38_p3 = scmp.ne.s32.totalorder %s1081_s10, %s1077_s9 }
   0x9   : > { %s1148_s17 = scalar_select %p23_p0, %s1085_s11, %s25_s16  }
   0xa   : > { %p1150_p4 = por %p33_p2, %p32_p1  ;;  %p39_p5 = scmp.eq.s32.totalorder %s1135_s13, 0 }
   0xb   : > { %p868_p6 = scmp.lt.s32.totalorder %s1089_s12, 2  ;;  %s1161_s20 = sand.u32 1, %s1085_s11  }
   0xc   : > { %p1156_p7 = por %p39_p5, %p38_p3  ;;  %s817_s21 = sshll.u32 %s1161_s20, 5 }
   0xd   : > { %s834_s22 = sshll.u32 %s1089_s12, 5  ;;  %s118_s26 = scalar_lea.vmem [#allocation2], %s817_s21 }
   0xe   : > { %s123_s25 = scalar_lea.hbm %s1676_s0, %s834_s22  ;;  %s126_s27 = sshll.u32 %s118_s26, 4  ;;  %s127_s27 = int_to_ptr.vmem [resolvable:$true] %s126_s27 }
   0xf   : > { %s124_s28 = sshll.u32 %s123_s25, 4  ;;  %p1170_p8 = pnand %p868_p6, %p1150_p4  ;;  %s125_s28 = int_to_ptr.hbm [resolvable:$true] %s124_s28 }
  0x10   : > { %p823_p9 = scmp.ge.s32.totalorder %s1089_s12, 1  ;;  %s115_s30 = scalar_lea.sflag [#allocation3], %s1161_s20 }
  0x11   : > { %s991_s3 = sshra.s32 %s125_s28, 4  ;;  %p995_p11 = pneg %p1170_p8  ;;  %s992_s3 = int_to_ptr.hbm [resolvable:$true] %s991_s3 }
  0x12   : > { %s993_s4 = scalar_lea.hbm %s992_s3, 32  ;;  %s998_s7 = scalar_lea.hbm %s1676_s0, 64 }
  0x13   : > { %p994_p10 = scmp.ne.s32.totalorder %s992_s3, %s993_s4  ;;  %p999_p0 = scmp.lt.s32.totalorder %s992_s3, %s1676_s0 }
  0x14   : > { %p1000_p1 = scmp.lt.s32.totalorder %s998_s7, %s993_s4 }
  0x15   : > { %p996_p12 = pnand %p995_p11, %p994_p10 }
  0x16   : > { %p1001_p2 = por %p1000_p1, %p999_p0 }
  0x17   : > { %p997_p13 = pneg %p996_p12 }
  0x19   : > { %p1002_p3 = pnand %p1001_p2, %p997_p13 }
  0x1b   : > { %1005 = shalt.err (!%p1002_p3)
}
  0x1c   : > { %s1091_s15 = smov 64   ;;  %s1092_s16 = smov 4  }
  0x1d   : > { %864 = dma.hbm_to_vmem [thread:$0]  (!%p1170_p8), %s125_s28, 512, %s127_s27, %s115_s30, %s1091_s15, %s1091_s15, %s1092_s16  }
  0x1e   : > { %p156_p4 = scmp.lt.s32.totalorder %s1089_s12, 3  ;;  %s820_s18 = sshll.u32 %s1161_s20, 4 }
  0x1f   : > { %s835_s21 = sshll.u32 %s1089_s12, 4  ;;  %s140_s26 = scalar_lea.vmem [#allocation4], %s820_s18 }
  0x20   : > { %p1194_p5 = pnand %p823_p9, %p156_p4  ;;  %s145_s25 = scalar_lea.hbm %s1677_s1, %s835_s21 }
  0x21   : > { %s148_s3 = sshll.u32 %s140_s26, 4  ;;  %s146_s4 = sshll.u32 %s145_s25, 4  ;;  %s149_s3 = int_to_ptr.vmem [resolvable:$true] %s148_s3  ;;  %s147_s4 = int_to_ptr.hbm [resolvable:$true] %s146_s4 }
  0x22   : > { %s137_s5 = scalar_lea.sflag [#allocation5], %s1161_s20  ;;  %s1021_s27 = sshra.s32 %s147_s4, 4  ;;  %s1022_s27 = int_to_ptr.hbm [resolvable:$true] %s1021_s27 }
  0x23   : > { %s1023_s28 = scalar_lea.hbm %s1022_s27, 16  ;;  %s1028_s6 = scalar_lea.hbm %s1677_s1, 32 }
  0x24   : > { %p1024_p6 = scmp.ne.s32.totalorder %s1022_s27, %s1023_s28  ;;  %p1029_p12 = scmp.lt.s32.totalorder %s1022_s27, %s1677_s1 }
  0x25   : > { %p1030_p13 = scmp.lt.s32.totalorder %s1028_s6, %s1023_s28 }
  0x26   : > { %p1026_p9 = pnand %p1024_p6, %p995_p11 }
  0x27   : > { %p1031_p0 = por %p1030_p13, %p1029_p12 }
  0x28   : > { %p1027_p10 = pneg %p1026_p9 }
  0x2a   : > { %p1032_p1 = pnand %p1031_p0, %p1027_p10 }
  0x2c   : > { %1035 = shalt.err (!%p1032_p1)
}
  0x2d   : > { %s1093_s20 = smov 128   ;;  %s1094_s9 = smov 8  }
  0x2e   : > { %867 = dma.hbm_to_vmem [thread:$0]  (!%p1170_p8), %s147_s4, 256, %s149_s3, %s137_s5, %s1093_s20, %s1093_s20, %s1094_s9  }
  0x2f   : > { %160 = sbr.rel (%p1194_p5) target bundleno = 705 (0x2c1), region = 28  ;;  %s162_s15 = sand.u32 (!%p1194_p5), 1, %s1081_s10  }
  0x30   : > { %s824_s16 = sshll.u32 (!%p1194_p5), %s162_s15, 5  ;;  %s163_s18 = scalar_lea.sflag (!%p1194_p5), [#allocation3], %s162_s15 }
  0x31   : > { %s166_s21 = scalar_lea.vmem (!%p1194_p5), [#allocation2], %s824_s16 }
  0x34   : > { %1068 = dma.done.wait (%p1156_p7), %s163_s18, 512  }
  0x35   : > { %1070 = vsyncadd (%p1156_p7), %s163_s18, 4294966784  ;;  %s825_s23 = sshll.u32 %s162_s15, 4  ;;  %s173_s24 = scalar_lea.sflag [#allocation5], %s162_s15 }
  0x36   : > { %s176_s25 = scalar_lea.vmem [#allocation4], %s825_s23 }
  0x37   : > { %1072 = dma.done.wait (%p1156_p7), %s173_s24, 256  }
  0x38   : > { %1074 = vsyncadd (%p1156_p7), %s173_s24, 4294967040  ;;  %v301_v0 = vlaneseq  ;;  %s1095_s29 = smov 16   ;;  %v1229_v2 = vld [vmem:[%s176_s25] sm:$0xff]  ;;  %v1231_v3 = vld [vmem:[%s176_s25 + $0x8] sm:$0xff]  ;;  %vm222_vm0 = vcmask 130048   ;;  %v1096_v10 = vmov 0.0  }
  0x39   : > { %v837_v4 = vld [vmem:[%s166_s21] sm:$0xff]   ;;  %vm285_vm1 = vcmp.eq.s32.totalorder %v1229_v2, 2  ;;  %vm286_vm2 = vcmp.eq.s32.totalorder %v1231_v3, 2  ;;  %v852_v6 = vld [vmem:[%s166_s21 + $0x8] sm:$0xff]   ;;  %v853_v7 = vld [vmem:[%s166_s21 + $0x10] sm:$0xff]   ;;  %vm283_vm3 = vcmp.eq.s32.totalorder %v1229_v2, 1 }
  0x3a   : > { %v1225_v1 = vand.u32 127, %v301_v0  ;;  %v839_v5 = vunpack.c.h.bf16 %v837_v4  ;;  %v854_v8 = vld [vmem:[%s166_s21 + $0x18] sm:$0xff]   ;;  %v838_v9 = vunpack.c.l.bf16 %v837_v4  ;;  %v1236_v11 = vsel %vm285_vm1, 1.0, %v1096_v10  ;;  %s1097_s19 = smov 15   ;;  %s1098_s22 = smov 1  }
  0x3b   : > { %v1239_v12 = vsel %vm286_vm2, 1.0, %v1096_v10  ;;  %v843_v13 = vunpack.c.h.bf16 %v852_v6  ;;  %v847_v14 = vunpack.c.h.bf16 %v853_v7  ;;  %v851_v16 = vunpack.c.h.bf16 %v854_v8  ;;  %s1099_s26 = smov 113   ;;  %s1100_s3 = smov 127  }
  0x3c   : > { %340 = vrot.lane.b32.xlu0 %v1225_v1, %s1095_s29  ;;  %v916_v15 = vpack.i.bf16 %v1239_v12, %v1236_v11  ;;  %v230_v17 = vsel %vm222_vm0, %v839_v5, -inf  ;;  %v842_v18 = vunpack.c.l.bf16 %v852_v6  ;;  %v846_v21 = vunpack.c.l.bf16 %v853_v7  ;;  %p201_p7 = scmp.lt.s32.totalorder %s1135_s13, 1 }
  0x3d   : > { %v231_v19 = vsel %vm222_vm0, %v843_v13, -inf  ;;  %v232_v20 = vsel %vm222_vm0, %v847_v14, -inf  ;;  %v850_v22 = vunpack.c.l.bf16 %v854_v8  ;;  %v234_v24 = vsel %vm222_vm0, %v851_v16, -inf }
  0x3e   : > { %v233_v23 = vmax.f32 %v230_v17, %v232_v20  ;;  %v223_v25 = vsel %vm222_vm0, %v838_v9, -inf  ;;  %v224_v26 = vsel %vm222_vm0, %v842_v18, -inf  ;;  %v235_v27 = vmax.f32 %v231_v19, %v234_v24  ;;  %s1688_s13 = smov (!%p201_p7, %s1135_s13), 1 }
  0x3f   : > { %v225_v28 = vsel %vm222_vm0, %v846_v21, -inf  ;;  %v227_v29 = vsel %vm222_vm0, %v850_v22, -inf  ;;  %vm284_vm4 = vcmp.eq.s32.totalorder %v1231_v3, 1  ;;  %v1255_v50 = vsel %vm283_vm3, 1.0, %v1096_v10  ;;  %s203_s27 = scalar_lea.vmem %s1678_s2, %s1688_s13 }
  0x40   : > { %v226_v30 = vmax.f32 %v223_v25, %v225_v28  ;;  %v228_v31 = vmax.f32 %v224_v26, %v227_v29  ;;  %v236_v32 = vmax.f32 %v233_v23, %v235_v27  ;;  %v1258_v51 = vsel %vm284_vm4, 1.0, %v1096_v10 }
  0x41   : > { %v911_v52 = vpack.i.bf16 %v1258_v51, %v1255_v50  ;;  %vm287_vm5 = vcmp.eq.s32.totalorder %v1229_v2, 3  ;;  %vm288_vm6 = vcmp.eq.s32.totalorder %v1231_v3, 3  ;;  %vm303_vm7 = vcmask 1047680  }
  0x42   : > { %v229_v33 = vmax.f32 %v226_v30, %v228_v31  ;;  %v238_v34 = vsub.f32 %v839_v5, %v236_v32  ;;  %v240_v35 = vsub.f32 %v843_v13, %v236_v32  ;;  %v242_v36 = vsub.f32 %v847_v14, %v236_v32 }
  0x43   : > { %v244_v37 = vsub.f32 %v851_v16, %v236_v32  ;;  %912 = vrot.lane.b32.xlu2 %v911_v52, %s1095_s29  ;;  %v1290_v25 = vsel %vm287_vm5, 1.0, %v1096_v10  ;;  %v1293_v26 = vsel %vm288_vm6, 1.0, %v1096_v10 }
  0x44   : > { %917 = vrot.lane.b32.xlu0 %v916_v15, %s1095_s29  ;;  %v237_v38 = vsub.f32 %v838_v9, %v229_v33  ;;  %v239_v39 = vsub.f32 %v842_v18, %v229_v33  ;;  %v247_v40 = vmul.f32 1.442695, %v238_v34  ;;  %v251_v41 = vmul.f32 1.442695, %v240_v35 }
  0x45   : > { %v255_v42 = vmul.f32 1.442695, %v242_v36  ;;  %v241_v43 = vsub.f32 %v846_v21, %v229_v33  ;;  %v259_v44 = vmul.f32 1.442695, %v244_v37  ;;  %v243_v45 = vsub.f32 %v850_v22, %v229_v33 }
  0x46   : > { %971 = vpow2.f32 %v247_v40  ;;  %v245_v46 = vmul.f32 1.442695, %v237_v38  ;;  %v249_v47 = vmul.f32 1.442695, %v239_v39  ;;  %v921_v2 = vpack.i.bf16 %v1293_v26, %v1290_v25 }
  0x47   : > { %973 = vpow2.f32 %v251_v41  ;;  %v253_v48 = vmul.f32 1.442695, %v241_v43  ;;  %v257_v49 = vmul.f32 1.442695, %v243_v45 }
  0x48   : > { %975 = vpow2.f32 %v255_v42 }
  0x49   : > { %977 = vpow2.f32 %v259_v44 }
  0x4a   : > { %979 = vpow2.f32 %v245_v46 }
  0x4b   : > { %981 = vpow2.f32 %v249_v47 }
  0x4c   : > { %v972_v53 = vpop.eup %971  ;;  %983 = vpow2.f32 %v253_v48 }
  0x4d   : > { %v974_v54 = vpop.eup %973  ;;  %v268_v55 = vsel %vm222_vm0, %v972_v53, 0.0  ;;  %985 = vpow2.f32 %v257_v49 }
  0x4e   : > { %v976_v56 = vpop.eup %975  ;;  %v269_v57 = vsel %vm222_vm0, %v974_v54, 0.0 }
  0x4f   : > { %v978_v58 = vpop.eup %977  ;;  %v270_v59 = vadd.f32 %v269_v57, %v268_v55  ;;  %v271_v60 = vsel %vm222_vm0, %v976_v56, 0.0 }
  0x50   : > { %v980_v61 = vpop.eup %979  ;;  %v273_v62 = vsel %vm222_vm0, %v978_v58, 0.0 }
  0x51   : > { %v982_v63 = vpop.eup %981  ;;  %v272_v4 = vadd.f32 %v271_v60, %v270_v59  ;;  %v261_v5 = vsel %vm222_vm0, %v980_v61, 0.0 }
  0x52   : > { %v984_v6 = vpop.eup %983  ;;  %v262_v7 = vsel %vm222_vm0, %v982_v63, 0.0 }
  0x53   : > { %v986_v8 = vpop.eup %985  ;;  %v274_v9 = vadd.f32 %v273_v62, %v272_v4  ;;  %v263_v13 = vadd.f32 %v262_v7, %v261_v5  ;;  %v264_v14 = vsel %vm222_vm0, %v984_v6, 0.0 }
  0x54   : > { %v266_v15 = vsel %vm222_vm0, %v986_v8, 0.0 }
  0x55   : > { %987 = vrcp.f32 %v274_v9  ;;  %v265_v16 = vadd.f32 %v264_v14, %v263_v13 }
  0x57   : > { %v267_v17 = vadd.f32 %v266_v15, %v265_v16 }
  0x59   : > { %989 = vrcp.f32 %v267_v17 }
  0x5b   : > { %v988_v18 = vpop.eup %987 }
  0x5c   : > { %v1271_v19 = vmul.f32 %v988_v18, %v974_v54  ;;  %v1273_v20 = vmul.f32 %v988_v18, %v976_v56  ;;  %v1287_v24 = vmul.f32 %v988_v18, %v978_v58 }
  0x5e   : > { %307 = vrot.lane.b32.xlu1 %v1271_v19, %s1095_s29  ;;  %313 = vrot.lane.b32.xlu2 %v1273_v20, %s1095_s29 }
  0x5f   : > { %v990_v21 = vpop.eup %989 }
  0x60   : > { %v1279_v22 = vmul.f32 %v990_v21, %v982_v63  ;;  %v1285_v23 = vmul.f32 %v990_v21, %v984_v6  ;;  %v1302_v3 = vmul.f32 %v990_v21, %v986_v8 }
  0x62   : > { %304 = vrot.lane.b32.xlu0 %v1279_v22, %s1095_s29 }
  0x66   : > { %310 = vrot.lane.b32.xlu1 %v1285_v23, %s1095_s29  ;;  %319 = vrot.lane.b32.xlu2 %v1287_v24, %s1095_s29 }
  0x6a   : > { %922 = vrot.lane.b32.xlu0 %v921_v2, %s1095_s29 }
  0x6e   : > { %316 = vrot.lane.b32.xlu1 %v1302_v3, %s1095_s29  ;;  %346 = vrot.lane.b32.xlu2 %v1225_v1, %s1097_s19 }
  0x72   : > { %389 = vrot.lane.b32.xlu0 %v1225_v1, %s1098_s22 }
  0x9d   : > { %v913_v10 = vpop.permute.xlu2 %912 }
  0x9e   : > { %v915_v28 = vunpack.i.h.bf16 %v913_v10  ;;  %v914_v29 = vunpack.i.l.bf16 %v913_v10 }
  0xa0   : > { %v537_v31 = vsel %vm303_vm7, %v914_v29, %v1255_v50  ;;  %v540_v32 = vsel %vm303_vm7, %v915_v28, %v1258_v51 }
  0xa1   : > { %v926_v33 = vpack.i.bf16 %v540_v32, %v537_v31 }
  0xa3   : > { %927 = vrot.lane.b32.xlu2 %v926_v33, %s1095_s29 }
  0xae   : > { %v341_v27 = vpop.permute.xlu0 %340 }
  0xaf   : > { %v342_v30 = vsel %vm303_vm7, %v341_v27, %v1225_v1 }
  0xb0   : > { %343 = vrot.lane.b32.xlu1 %v342_v30, %s1095_s29 }
  0xb6   : > { %v918_v34 = vpop.permute.xlu0 %917 }
  0xb7   : > { %v920_v35 = vunpack.i.h.bf16 %v918_v34  ;;  %v919_v36 = vunpack.i.l.bf16 %v918_v34 }
  0xb8   : > { %v314_v40 = vpop.permute.xlu2 %313 }
  0xb9   : > { %v543_v37 = vsel %vm303_vm7, %v919_v36, %v1236_v11  ;;  %v546_v38 = vsel %vm303_vm7, %v920_v35, %v1239_v12  ;;  %v315_v48 = vsel %vm303_vm7, %v314_v40, %v1273_v20 }
  0xba   : > { %v931_v39 = vpack.i.bf16 %v546_v38, %v543_v37 }
  0xbc   : > { %932 = vrot.lane.b32.xlu0 %v931_v39, %s1095_s29 }
  0xc0   : > { %v320_v44 = vpop.permute.xlu2 %319 }
  0xc1   : > { %v321_v46 = vsel %vm303_vm7, %v320_v44, %v1287_v24 }
  0xc8   : > { %v347_v60 = vpop.permute.xlu2 %346 }
  0xd0   : > { %v308_v41 = vpop.permute.xlu1 %307 }
  0xd1   : > { %v309_v42 = vsel %vm303_vm7, %v308_v41, %v1271_v19 }
  0xd2   : > { %324 = vrot.lane.b32.xlu2 %v309_v42, %s1095_s29 }
  0xd4   : > { %v305_v43 = vpop.permute.xlu0 %304 }
  0xd5   : > { %v306_v45 = vsel %vm303_vm7, %v305_v43, %v1279_v22 }
  0xd6   : > { %322 = vrot.lane.b32.xlu1 %v306_v45, %s1095_s29 }
  0xd8   : > { %v311_v47 = vpop.permute.xlu1 %310 }
  0xd9   : > { %v312_v59 = vsel %vm303_vm7, %v311_v47, %v1285_v23 }
  0xda   : > { %332 = vrot.lane.b32.xlu2 %v321_v46, %s1095_s29 }
  0xdc   : > { %v923_v49 = vpop.permute.xlu0 %922 }
  0xdd   : > { %v925_v52 = vunpack.i.h.bf16 %v923_v49  ;;  %v924_v53 = vunpack.i.l.bf16 %v923_v49 }
  0xde   : > { %328 = vrot.lane.b32.xlu1 %v315_v48, %s1095_s29 }
  0xdf   : > { %v549_v54 = vsel %vm303_vm7, %v924_v53, %v1290_v25  ;;  %v552_v55 = vsel %vm303_vm7, %v925_v52, %v1293_v26 }
  0xe0   : > { %v936_v56 = vpack.i.bf16 %v552_v55, %v549_v54  ;;  %v317_v57 = vpop.permute.xlu1 %316 }
  0xe1   : > { %v318_v58 = vsel %vm303_vm7, %v317_v57, %v1302_v3 }
  0xe2   : > { %937 = vrot.lane.b32.xlu0 %v936_v56, %s1095_s29 }
  0xe4   : > { %v390_v6 = vpop.permute.xlu0 %389 }
  0xe6   : > { %330 = vrot.lane.b32.xlu1 %v318_v58, %s1095_s29 }
  0xea   : > { %326 = vrot.lane.b32.xlu0 %v312_v59, %s1095_s29 }
  0xfd   : > { %v928_v61 = vpop.permute.xlu2 %927 }
  0xfe   : > { %v930_v63 = vunpack.i.h.bf16 %v928_v61  ;;  %v929_v4 = vunpack.i.l.bf16 %v928_v61 }
 0x100   : > { %v565_v14 = vsel %vm303_vm7, %v929_v4, %v1255_v50  ;;  %v566_v15 = vsel %vm303_vm7, %v930_v63, %v1258_v51 }
 0x122   : > { %v344_v62 = vpop.permute.xlu1 %343 }
 0x123   : > { %v345_v5 = vsel %vm303_vm7, %v344_v62, %v1225_v1 }
 0x124   : > { %v348_v7 = vsub.s32 %v345_v5, %v347_v60  ;;  %v391_v8 = vsub.s32 %v345_v5, %v390_v6 }
 0x126   : > { %vm349_vm8 = vcmp.lt.s32.totalorder %v348_v7, 0  ;;  %v350_v9 = vsub.s32 0, %v348_v7  ;;  %vm392_vm9 = vcmp.lt.s32.totalorder %v391_v8, 0  ;;  %v393_v13 = vsub.s32 0, %v391_v8 }
 0x128   : > { %v1350_v16 = vsel %vm349_vm8, %v350_v9, %v348_v7  ;;  %v1352_v17 = vsel %vm392_vm9, %v393_v13, %v391_v8 }
 0x129   : > { %vm352_vm10 = vcmp.eq.s32.totalorder %v1350_v16, 1  ;;  %vm395_vm11 = vcmp.eq.s32.totalorder %v1352_v17, 1 }
 0x12a   : > { %v571_v1 = vsel %vm352_vm10, %v565_v14, 0.0  ;;  %v572_v18 = vsel %vm352_vm10, %v566_v15, 0.0  ;;  %v607_v10 = vsel %vm395_vm11, %v565_v14, 0.0  ;;  %v608_v27 = vsel %vm395_vm11, %v566_v15, 0.0 }
 0x12b   : > { %v941_v21 = vpack.i.bf16 %v572_v18, %v571_v1  ;;  %v956_v30 = vpack.i.bf16 %v608_v27, %v607_v10  ;;  %v1443_v10 = vshrl.u32 %v301_v0, 7 }
 0x12c   : > { %v325_v35 = vpop.permute.xlu2 %324 }
 0x12d   : > { %942 = vrot.lane.b32.xlu2 %v941_v21, %s1099_s26  ;;  %v335_v37 = vsel %vm303_vm7, %v325_v35, %v1271_v19  ;;  %vm441_vm12 = vcmp.lt.s32.totalorder %v1443_v10, 1  ;;  %vm480_vm13 = vcmp.lt.s32.totalorder %v1443_v10, 7  ;;  %v487_v0 = vrot.slane %v1443_v10, 1 }
 0x12e   : > { %v933_v2 = vpop.permute.xlu0 %932  ;;  %v397_v38 = vsel %vm395_vm11, %v335_v37, 0.0  ;;  %v354_v42 = vsel %vm352_vm10, %v335_v37, 0.0 }
 0x12f   : > { %v935_v28 = vunpack.i.h.bf16 %v933_v2  ;;  %v934_v29 = vunpack.i.l.bf16 %v933_v2 }
 0x131   : > { %v567_v31 = vsel %vm303_vm7, %v934_v29, %v1236_v11  ;;  %v568_v32 = vsel %vm303_vm7, %v935_v28, %v1239_v12  ;;  %v434_v28 = vadd.s32 8, %v1443_v10  ;;  %v448_v29 = vrot.slane %v1443_v10, 7 }
 0x132   : > { %v573_v33 = vsel %vm352_vm10, %v567_v31, 0.0  ;;  %v574_v34 = vsel %vm352_vm10, %v568_v32, 0.0  ;;  %v609_v39 = vsel %vm395_vm11, %v567_v31, 0.0  ;;  %v610_v40 = vsel %vm395_vm11, %v568_v32, 0.0 }
 0x133   : > { %v946_v36 = vpack.i.bf16 %v574_v34, %v573_v33  ;;  %v961_v41 = vpack.i.bf16 %v610_v40, %v609_v39  ;;  %v488_v37 = vrot.slane %v434_v28, 1 }
 0x134   : > { %v333_v43 = vpop.permute.xlu2 %332 }
 0x135   : > { %957 = vrot.lane.b32.xlu2 %v956_v30, %s1100_s3  ;;  %947 = vrot.lane.b32.xlu0 %v946_v36, %s1099_s26  ;;  %v339_v44 = vsel %vm303_vm7, %v333_v43, %v1287_v24  ;;  %v449_v30 = vrot.slane %v434_v28, 7 }
 0x136   : > { %v358_v45 = vsel %vm352_vm10, %v339_v44, 0.0  ;;  %v401_v4 = vsel %vm395_vm11, %v339_v44, 0.0 }
 0x137   : > { %v451_v36 = vsel %vm441_vm12, %v449_v30, %v448_v29  ;;  %v450_v43 = vsel %vm441_vm12, %v448_v29, %v449_v30 }
 0x13d   : > { %367 = vrot.lane.b32.xlu2 %v354_v42, %s1099_s26  ;;  %962 = vrot.lane.b32.xlu0 %v961_v41, %s1100_s3 }
 0x145   : > { %375 = vrot.lane.b32.xlu2 %v358_v45, %s1099_s26 }
 0x148   : > { %v323_v53 = vpop.permute.xlu1 %322 }
 0x149   : > { %v334_v61 = vsel %vm303_vm7, %v323_v53, %v1279_v22  ;;  %v490_v53 = vsel %vm480_vm13, %v488_v37, %v487_v0 }
 0x14a   : > { %v353_v63 = vsel %vm352_vm10, %v334_v61, 0.0  ;;  %v396_v5 = vsel %vm395_vm11, %v334_v61, 0.0  ;;  %v492_v61 = vsub.s32 %v490_v53, %v434_v28 }
 0x14c   : > { %vm496_vm2 = vcmp.lt.s32.totalorder %v492_v61, 0 }
 0x150   : > { %v329_v62 = vpop.permute.xlu1 %328 }
 0x151   : > { %v337_v6 = vsel %vm303_vm7, %v329_v62, %v1273_v20 }
 0x152   : > { %v356_v7 = vsel %vm352_vm10, %v337_v6, 0.0  ;;  %v399_v9 = vsel %vm395_vm11, %v337_v6, 0.0 }
 0x154   : > { %v938_v46 = vpop.permute.xlu0 %937 }
 0x155   : > { %v940_v47 = vunpack.i.h.bf16 %v938_v46  ;;  %v939_v48 = vunpack.i.l.bf16 %v938_v46 }
 0x157   : > { %v569_v49 = vsel %vm303_vm7, %v939_v48, %v1290_v25  ;;  %v570_v52 = vsel %vm303_vm7, %v940_v47, %v1293_v26  ;;  %v452_v48 = vsub.s32 %v451_v36, %v1443_v10 }
 0x158   : > { %v575_v54 = vsel %vm352_vm10, %v569_v49, 0.0  ;;  %v576_v55 = vsel %vm352_vm10, %v570_v52, 0.0  ;;  %v331_v8 = vpop.permute.xlu1 %330  ;;  %v611_v15 = vsel %vm395_vm11, %v569_v49, 0.0  ;;  %v612_v1 = vsel %vm395_vm11, %v570_v52, 0.0 }
 0x159   : > { %v951_v56 = vpack.i.bf16 %v576_v55, %v575_v54  ;;  %v338_v13 = vsel %vm303_vm7, %v331_v8, %v1302_v3  ;;  %v966_v18 = vpack.i.bf16 %v612_v1, %v611_v15  ;;  %v489_v49 = vsel %vm480_vm13, %v487_v0, %v488_v37 }
 0x15a   : > { %v357_v14 = vsel %vm352_vm10, %v338_v13, 0.0  ;;  %v400_v21 = vsel %vm395_vm11, %v338_v13, 0.0  ;;  %v453_v52 = vsub.s32 %v450_v43, %v434_v28  ;;  %vm454_vm14 = vcmp.lt.s32.totalorder %v452_v48, 0 }
 0x15b   : > { %952 = vrot.lane.b32.xlu1 %v951_v56, %s1099_s26 }
 0x15c   : > { %v327_v57 = vpop.permute.xlu0 %326  ;;  %vm457_vm15 = vcmp.lt.s32.totalorder %v453_v52, 0 }
 0x15d   : > { %v336_v58 = vsel %vm303_vm7, %v327_v57, %v1285_v23  ;;  %vm730_vm7 = vcmask 0  }
 0x15e   : > { %v398_v59 = vsel %vm395_vm11, %v336_v58, 0.0  ;;  %v355_v60 = vsel %vm352_vm10, %v336_v58, 0.0 }
 0x15f   : > { %412 = vrot.lane.b32.xlu2 %v398_v59, %s1100_s3  ;;  %369 = vrot.lane.b32.xlu0 %v355_v60, %s1099_s26  ;;  %v455_v59 = vsub.s32 0, %v452_v48  ;;  %v491_v60 = vsub.s32 %v489_v49, %v1443_v10 }
 0x161   : > { %vm493_vm1 = vcmp.lt.s32.totalorder %v491_v60, 0  ;;  %v494_v13 = vsub.s32 0, %v491_v60 }
 0x163   : > { %365 = vrot.lane.b32.xlu1 %v353_v63, %s1099_s26  ;;  %v458_v63 = vsub.s32 0, %v453_v52  ;;  %v1484_v30 = vsel %vm493_vm1, %v494_v13, %v491_v60  ;;  %v1521_v13 = vmul.f32 1.125, %v1255_v50 }
 0x164   : > { %vm499_vm5 = vcmp.eq.s32.totalorder %v1484_v30, 1 }
 0x165   : > { %v1472_v15 = vsel %vm457_vm15, %v458_v63, %v453_v52 }
 0x166   : > { %vm461_vm4 = vcmp.eq.s32.totalorder %v1472_v15, 1 }
 0x167   : > { %418 = vrot.lane.b32.xlu2 %v401_v4, %s1100_s3  ;;  %408 = vrot.lane.b32.xlu0 %v396_v5, %s1100_s3 }
 0x16b   : > { %371 = vrot.lane.b32.xlu1 %v356_v7, %s1099_s26 }
 0x16f   : > { %414 = vrot.lane.b32.xlu0 %v399_v9, %s1100_s3  ;;  %v1470_v9 = vsel %vm454_vm14, %v455_v59, %v452_v48 }
 0x170   : > { %vm460_vm3 = vcmp.eq.s32.totalorder %v1470_v9, 1 }
 0x173   : > { %373 = vrot.lane.b32.xlu1 %v357_v14, %s1099_s26  ;;  %v497_v14 = vsub.s32 0, %v492_v61 }
 0x177   : > { %967 = vrot.lane.b32.xlu0 %v966_v18, %s1100_s3 }
 0x17b   : > { %410 = vrot.lane.b32.xlu1 %v397_v38, %s1100_s3 }
 0x183   : > { %416 = vrot.lane.b32.xlu1 %v400_v21, %s1100_s3 }
 0x187   : > { %v943_v16 = vpop.permute.xlu2 %942 }
 0x188   : > { %v945_v34 = vunpack.i.h.bf16 %v943_v16  ;;  %v944_v35 = vunpack.i.l.bf16 %v943_v16 }
 0x18a   : > { %v602_v44 = vadd.f32 %v945_v34, %v1258_v51  ;;  %v601_v45 = vadd.f32 %v944_v35, %v1255_v50 }
 0x18f   : > { %v958_v27 = vpop.permute.xlu2 %957 }
 0x190   : > { %v960_v46 = vunpack.i.h.bf16 %v958_v27  ;;  %v959_v47 = vunpack.i.l.bf16 %v958_v27 }
 0x192   : > { %v638_v57 = vadd.f32 %v960_v46, %v602_v44  ;;  %v637_v58 = vadd.f32 %v959_v47, %v601_v45 }
 0x194   : > { %v646_v7 = vrot.slane %v638_v57, 7  ;;  %v643_v8 = vrot.slane %v637_v58, 7  ;;  %v670_v27 = vrot.slane %v638_v57, 1  ;;  %v667_v29 = vrot.slane %v637_v58, 1 }
 0x196   : > { %v652_v28 = vsel %vm441_vm12, %v646_v7, %v643_v8  ;;  %v649_v34 = vsel %vm441_vm12, %v643_v8, %v646_v7  ;;  %v676_v46 = vsel %vm480_vm13, %v670_v27, %v667_v29 }
 0x197   : > { %v1448_v17 = vpop.permute.xlu2 %367  ;;  %v655_v37 = vsel %vm460_vm3, %v652_v28, 0.0 }
 0x198   : > { %v661_v45 = vadd.f32 %v655_v37, %v637_v58  ;;  %v384_v50 = vadd.f32 %v1448_v17, %v1271_v19 }
 0x19f   : > { %v376_v62 = vpop.permute.xlu2 %375 }
 0x1a7   : > { %v948_v2 = vpop.permute.xlu0 %947 }
 0x1a8   : > { %v950_v31 = vunpack.i.h.bf16 %v948_v2  ;;  %v949_v32 = vunpack.i.l.bf16 %v948_v2 }
 0x1aa   : > { %v604_v38 = vadd.f32 %v950_v31, %v1239_v12  ;;  %v603_v39 = vadd.f32 %v949_v32, %v1236_v11 }
 0x1af   : > { %v963_v33 = vpop.permute.xlu0 %962 }
 0x1b0   : > { %v965_v40 = vunpack.i.h.bf16 %v963_v33  ;;  %v964_v41 = vunpack.i.l.bf16 %v963_v33  ;;  %v1488_v33 = vsel %vm496_vm2, %v497_v14, %v492_v61 }
 0x1b1   : > { %vm500_vm6 = vcmp.eq.s32.totalorder %v1488_v33, 1 }
 0x1b2   : > { %v639_v54 = vadd.f32 %v964_v41, %v603_v39  ;;  %v640_v55 = vadd.f32 %v965_v40, %v604_v38  ;;  %v673_v39 = vsel %vm480_vm13, %v667_v29, %v670_v27  ;;  %v656_v41 = vsel %vm461_vm4, %v649_v34, 0.0 }
 0x1b3   : > { %v679_v49 = vsel %vm499_vm5, %v673_v39, 0.0  ;;  %v680_v59 = vsel %vm500_vm6, %v676_v46, 0.0 }
 0x1b4   : > { %v644_v4 = vrot.slane %v639_v54, 7  ;;  %v647_v5 = vrot.slane %v640_v55, 7  ;;  %v668_v18 = vrot.slane %v639_v54, 1  ;;  %v671_v21 = vrot.slane %v640_v55, 1 }
 0x1b5   : > { %v685_v61 = vadd.f32 %v679_v49, %v661_v45 }
 0x1b6   : > { %v653_v1 = vsel %vm441_vm12, %v647_v5, %v644_v4  ;;  %v650_v2 = vsel %vm441_vm12, %v644_v4, %v647_v5  ;;  %v674_v36 = vsel %vm480_vm13, %v668_v18, %v671_v21  ;;  %v677_v38 = vsel %vm480_vm13, %v671_v21, %v668_v18 }
 0x1b7   : > { %v657_v31 = vsel %vm460_vm3, %v653_v1, 0.0  ;;  %v658_v35 = vsel %vm461_vm4, %v650_v2, 0.0  ;;  %v681_v44 = vsel %vm499_vm5, %v674_v36, 0.0  ;;  %v682_v47 = vsel %vm500_vm6, %v677_v38, 0.0 }
 0x1b8   : > { %v663_v40 = vadd.f32 %v657_v31, %v639_v54  ;;  %v664_v43 = vadd.f32 %v658_v35, %v640_v55  ;;  %v662_v54 = vadd.f32 %v656_v41, %v638_v57  ;;  %v388_v57 = vadd.f32 %v376_v62, %v1287_v24 }
 0x1b9   : > { %v413_v32 = vpop.permute.xlu2 %412  ;;  %v1527_v1 = vmul.f32 1.125, %v1236_v11  ;;  %v1532_v2 = vmul.f32 1.125, %v1258_v51  ;;  %v1537_v27 = vmul.f32 0.125, %v685_v61  ;;  %v1577_v61 = vmul.f32 1.125, %v1271_v19 }
 0x1ba   : > { %v687_v55 = vadd.f32 %v681_v44, %v663_v40  ;;  %v688_v58 = vadd.f32 %v682_v47, %v664_v43  ;;  %v1558_v43 = vmul.f32 1.125, %v1273_v20 }
 0x1bb   : > { %v703_v30 = vsub.f32 %v1537_v27, %v1521_v13 }
 0x1bc   : > { %v1524_v14 = vmul.f32 0.125, %v687_v55  ;;  %v1529_v18 = vmul.f32 0.125, %v688_v58 }
 0x1be   : > { %v705_v36 = vsub.f32 %v1524_v14, %v1527_v1 }
 0x1c1   : > { %v419_v5 = vpop.permute.xlu2 %418 }
 0x1c2   : > { %v1541_v62 = vadd.f32 %v419_v5, %v388_v57 }
 0x1c4   : > { %v440_v39 = vrot.slane %v1541_v62, 7  ;;  %v479_v44 = vrot.slane %v1541_v62, 1 }
 0x1cd   : > { %v1456_v42 = vpop.permute.xlu1 %952 }
 0x1ce   : > { %v955_v63 = vunpack.i.h.bf16 %v1456_v42  ;;  %v954_v7 = vunpack.i.l.bf16 %v1456_v42  ;;  %v1535_v42 = vmul.f32 1.125, %v1239_v12 }
 0x1d0   : > { %v606_v28 = vadd.f32 %v955_v63, %v1293_v26  ;;  %v605_v29 = vadd.f32 %v954_v7, %v1290_v25  ;;  %v706_v38 = vsub.f32 %v1529_v18, %v1535_v42  ;;  %v1580_v63 = vmul.f32 1.125, %v1290_v25 }
 0x1d1   : > { %v370_v56 = vpop.permute.xlu0 %369 }
 0x1d2   : > { %v385_v52 = vadd.f32 %v370_v56, %v1285_v23  ;;  %v686_v56 = vadd.f32 %v680_v59, %v662_v54 }
 0x1d4   : > { %v428_v8 = vadd.f32 %v413_v32, %v385_v52  ;;  %v1545_v51 = vmul.f32 0.125, %v686_v56 }
 0x1d5   : > { %v1468_v6 = vpop.permute.xlu1 %365 }
 0x1d6   : > { %v436_v31 = vrot.slane %v428_v8, 7  ;;  %v383_v12 = vadd.f32 %v1468_v6, %v1279_v22  ;;  %v475_v40 = vrot.slane %v428_v8, 1  ;;  %v704_v33 = vsub.f32 %v1545_v51, %v1532_v2 }
 0x1d9   : > { %v1476_v16 = vpop.permute.xlu0 %408 }
 0x1da   : > { %v426_v41 = vadd.f32 %v1476_v16, %v383_v12  ;;  %v1568_v16 = vmul.f32 1.125, %v1285_v23 }
 0x1dc   : > { %v435_v59 = vrot.slane %v426_v41, 7  ;;  %v474_v23 = vrot.slane %v426_v41, 1 }
 0x1dd   : > { %v372_v0 = vpop.permute.xlu1 %371 }
 0x1de   : > { %v386_v53 = vadd.f32 %v372_v0, %v1273_v20 }
 0x1e1   : > { %v415_v48 = vpop.permute.xlu0 %414 }
 0x1e2   : > { %v429_v60 = vadd.f32 %v415_v48, %v386_v53 }
 0x1e4   : > { %v439_v21 = vrot.slane %v429_v60, 7  ;;  %v478_v35 = vrot.slane %v429_v60, 1 }
 0x1e5   : > { %v374_v4 = vpop.permute.xlu1 %373 }
 0x1e6   : > { %v446_v17 = vsel %vm441_vm12, %v439_v21, %v436_v31  ;;  %v443_v45 = vsel %vm441_vm12, %v436_v31, %v439_v21  ;;  %v482_v49 = vsel %vm480_vm13, %v475_v40, %v478_v35  ;;  %v485_v7 = vsel %vm480_vm13, %v478_v35, %v475_v40 }
 0x1e7   : > { %v464_v48 = vsel %vm460_vm3, %v446_v17, 0.0  ;;  %v465_v58 = vsel %vm461_vm4, %v443_v45, 0.0  ;;  %v503_v56 = vsel %vm499_vm5, %v482_v49, 0.0  ;;  %v387_v25 = vadd.f32 %v374_v4, %v1302_v3 }
 0x1e8   : > { %v470_v5 = vadd.f32 %v464_v48, %v428_v8  ;;  %v504_v40 = vsel %vm500_vm6, %v485_v7, 0.0  ;;  %v702_v7 = vmul.f32 1.125, %v1293_v26 }
 0x1e9   : > { %v968_v11 = vpop.permute.xlu0 %967 }
 0x1ea   : > { %v970_v32 = vunpack.i.h.bf16 %v968_v11  ;;  %v969_v34 = vunpack.i.l.bf16 %v968_v11 }
 0x1ec   : > { %v641_v0 = vadd.f32 %v969_v34, %v605_v29  ;;  %v642_v37 = vadd.f32 %v970_v32, %v606_v28  ;;  %v471_v28 = vadd.f32 %v465_v58, %v429_v60 }
 0x1ed   : > { %v411_v6 = vpop.permute.xlu1 %410 }
 0x1ee   : > { %v645_v46 = vrot.slane %v641_v0, 7  ;;  %v648_v47 = vrot.slane %v642_v37, 7  ;;  %v427_v52 = vadd.f32 %v411_v6, %v384_v50  ;;  %v669_v54 = vrot.slane %v641_v0, 1 }
 0x1ef   : > { %v672_v55 = vrot.slane %v642_v37, 1  ;;  %v509_v6 = vadd.f32 %v503_v56, %v470_v5  ;;  %v519_v5 = vmul.f32 1.125, %v1279_v22 }
 0x1f0   : > { %v651_v20 = vsel %vm441_vm12, %v645_v46, %v648_v47  ;;  %v654_v53 = vsel %vm441_vm12, %v648_v47, %v645_v46  ;;  %v438_v50 = vrot.slane %v427_v52, 7  ;;  %v477_v19 = vrot.slane %v427_v52, 1 }
 0x1f1   : > { %v659_v57 = vsel %vm460_vm3, %v654_v53, 0.0  ;;  %v660_v21 = vsel %vm461_vm4, %v651_v20, 0.0  ;;  %v675_v8 = vsel %vm480_vm13, %v669_v54, %v672_v55  ;;  %v678_v11 = vsel %vm480_vm13, %v672_v55, %v669_v54 }
 0x1f2   : > { %v442_v29 = vsel %vm441_vm12, %v435_v59, %v438_v50  ;;  %v445_v31 = vsel %vm441_vm12, %v438_v50, %v435_v59  ;;  %v481_v32 = vsel %vm480_vm13, %v474_v23, %v477_v19  ;;  %v484_v60 = vsel %vm480_vm13, %v477_v19, %v474_v23 }
 0x1f3   : > { %v665_v4 = vadd.f32 %v659_v57, %v641_v0  ;;  %v666_v12 = vadd.f32 %v660_v21, %v642_v37  ;;  %v462_v35 = vsel %vm460_vm3, %v445_v31, 0.0  ;;  %v463_v17 = vsel %vm461_vm4, %v442_v29, 0.0 }
 0x1f4   : > { %v468_v45 = vadd.f32 %v462_v35, %v426_v41  ;;  %v469_v46 = vadd.f32 %v463_v17, %v427_v52  ;;  %v510_v47 = vadd.f32 %v504_v40, %v471_v28  ;;  %v501_v48 = vsel %vm499_vm5, %v481_v32, 0.0 }
 0x1f5   : > { %v417_v34 = vpop.permute.xlu1 %416  ;;  %v502_v0 = vsel %vm500_vm6, %v484_v60, 0.0  ;;  %v683_v49 = vsel %vm499_vm5, %v675_v8, 0.0  ;;  %v684_v20 = vsel %vm500_vm6, %v678_v11, 0.0  ;;  %v515_v19 = vmul.f32 0.125, %v509_v6 }
 0x1f6   : > { %v430_v37 = vadd.f32 %v417_v34, %v387_v25  ;;  %v507_v53 = vadd.f32 %v501_v48, %v468_v45  ;;  %v508_v54 = vadd.f32 %v502_v0, %v469_v46  ;;  %v689_v55 = vadd.f32 %v683_v49, %v665_v4 }
 0x1f7   : > { %v690_v59 = vadd.f32 %v684_v20, %v666_v12  ;;  %v516_v22 = vmul.f32 0.125, %v510_v47  ;;  %v524_v31 = vmul.f32 1.125, %v1287_v24  ;;  %v527_v4 = vsub.f32 %v515_v19, %v1568_v16 }
 0x1f8   : > { %v437_v41 = vrot.slane %v430_v37, 7  ;;  %v476_v52 = vrot.slane %v430_v37, 1  ;;  %v513_v58 = vmul.f32 0.125, %v507_v53  ;;  %v514_v23 = vmul.f32 0.125, %v508_v54 }
 0x1f9   : > { %v695_v25 = vmul.f32 0.125, %v689_v55  ;;  %v696_v8 = vmul.f32 0.125, %v690_v59  ;;  %v528_v34 = vsub.f32 %v516_v22, %v1558_v43  ;;  %v710_v43 = vmax.f32 %v704_v33, %v706_v38 }
 0x1fa   : > { %v444_v56 = vsel %vm441_vm12, %v437_v41, %v440_v39  ;;  %v447_v57 = vsel %vm441_vm12, %v440_v39, %v437_v41  ;;  %v483_v21 = vsel %vm480_vm13, %v476_v52, %v479_v44  ;;  %v486_v50 = vsel %vm480_vm13, %v479_v44, %v476_v52 }
 0x1fb   : > { %v466_v26 = vsel %vm460_vm3, %v447_v57, 0.0  ;;  %v467_v28 = vsel %vm461_vm4, %v444_v56, 0.0  ;;  %v505_v39 = vsel %vm499_vm5, %v483_v21, 0.0  ;;  %v506_v10 = vsel %vm500_vm6, %v486_v50, 0.0 }
 0x1fc   : > { %v472_v11 = vadd.f32 %v466_v26, %v430_v37  ;;  %v473_v29 = vadd.f32 %v467_v28, %v1541_v62  ;;  %v523_v44 = vmul.f32 1.125, %v1302_v3  ;;  %v526_v9 = vsub.f32 %v514_v23, %v1577_v61 }
 0x1fd   : > { %v525_v60 = vsub.f32 %v513_v58, %v519_v5  ;;  %v707_v3 = vsub.f32 %v695_v25, %v1580_v63  ;;  %v708_v24 = vsub.f32 %v696_v8, %v702_v7  ;;  %v709_v61 = vmax.f32 %v703_v30, %v705_v36 }
 0x1fe   : > { %v511_v32 = vadd.f32 %v505_v39, %v472_v11  ;;  %v512_v15 = vadd.f32 %v506_v10, %v473_v29  ;;  %v532_v13 = vmax.f32 %v526_v9, %v528_v34 }
 0x1ff   : > { %v531_v17 = vmax.f32 %v525_v60, %v527_v4  ;;  %v711_v2 = vmax.f32 %v709_v61, %v707_v3  ;;  %v712_v51 = vmax.f32 %v710_v43, %v708_v24 }
 0x200   : > { %v517_v62 = vmul.f32 0.125, %v511_v32  ;;  %v518_v12 = vmul.f32 0.125, %v512_v15 }
 0x202   : > { %v529_v16 = vsub.f32 %v517_v62, %v523_v44  ;;  %v530_v35 = vsub.f32 %v518_v12, %v524_v31 }
 0x204   : > { %v533_v27 = vmax.f32 %v531_v17, %v529_v16  ;;  %v534_v40 = vmax.f32 %v532_v13, %v530_v35 }
 0x206   : > { %v713_v6 = vsub.f32 %v533_v27, %v711_v2  ;;  %v714_v63 = vsub.f32 %v534_v40, %v712_v51 }
 0x208   : > { %v715_v45 = vmul.f32 %v713_v6, %v713_v6  ;;  %v716_v46 = vmul.f32 %v714_v63, %v714_v63 }
 0x20a   : > { %v717_v14 = vsel %vm222_vm0, %v715_v45, 0.0  ;;  %v718_v1 = vsel %vm222_vm0, %v716_v46, 0.0 }
 0x20b   : > { %v719_v18 = vadd.f32 %v718_v1, %v717_v14 }
 0x20d   : > { %720 = vadd.xlane.f32.xlu1 %v719_v18 }
 0x280   : > { %v721_v42 = vpop.xlane.xlu1 %720 }
 0x281   : > { %v722_v36 = vrot.slane %v721_v42, 4 }
 0x283   : > { %v723_v38 = vadd.f32 %v722_v36, %v721_v42 }
 0x285   : > { %v724_v47 = vrot.slane %v723_v38, 2 }
 0x287   : > { %v725_v48 = vadd.f32 %v724_v47, %v723_v38 }
 0x289   : > { %v726_v0 = vrot.slane %v725_v48, 1 }
 0x28b   : > { %v727_v37 = vadd.f32 %v726_v0, %v725_v48 }
 0x28d   : > { %855 = vpush %v727_v37 }
 0x2be   : > { %s856_s28 = spop %855 }
 0x2bf   : > { %v729_v49 = vstv %s856_s28 }
 0x2c0   : > { %731 = vst.msk [vmem:[%s203_s27] sm:$0x1] %vm730_vm7, %v729_v49 }
 0x2c1 PF: > { %p15_p8 = scmp.ge.s32.totalorder %s1138_s14, 4   ;;  %s1683_s9 = smov %s1081_s10 }
 0x2c2   : > { %s1684_s10 = smov %s1085_s11  ;;  %s1685_s11 = smov %s1148_s17 }
 0x2c3   : > { %s1686_s12 = smov %s1138_s14  ;;  %17 = sbr.rel (!%p15_p8) target bundleno = 5 (0x5), region = 81 }
 0x2c8   :  { %749 = vsyncpa [#allocation3], 1 }
 0x2c9   :  { %751 = vsyncpa [#allocation3 + $0x1], 1 }
 0x2ca   :  { %752 = vsyncpa [#allocation5], 1 }
 0x2cb   :  { %754 = vsyncpa [#allocation5 + $0x1], 1 }

</bundles_post_ra>
